<compile_context>
chip_gen: v5e
topology: v5e:2x2
jax: 0.10.0
libtpu: 0.0.40
codegen_flags: <defaults>
</compile_context>

<pallas_src>
import jax
import jax.numpy as jnp
from jax.experimental import pallas as pl
from jax.experimental.pallas import tpu as pltpu

C, H, W = 4, 16, 16
HW = H * W  # 256 -> lane-dense (multiple of 128)


def _make_collate_kernel(n):
    """Kernel: concat n (C, HW) samples -> (n*C, HW), then x*scale + bias."""

    def kernel(*refs):
        x_refs = refs[:n]                       # n x (C, HW)
        scale_ref = refs[n]                     # (n*C, 1)
        bias_ref = refs[n + 1]                  # (n*C, 1)
        o_ref = refs[n + 2]                     # (n*C, HW)
        # Assemble the batch inside the kernel (sublane-dense (8, 256) slab),
        # then one fused multiply-add over full vregs and one unmasked store.
        x = jnp.concatenate([r[...] for r in x_refs], axis=0)
        o_ref[...] = x * scale_ref[...] + bias_ref[...]

    return kernel


def pallas_collate(samples, mean, std):
    """Collate a list of (C, H, W) samples into a normalized (N, C, H, W) batch.

    The whole batch (8 KiB) is processed in a single grid-less pallas_call:
    each sample is passed as its own VMEM-resident input (no host-side stack),
    and per-channel normalization is a single scale+bias FMA on a dense
    (N*C, HW) slab.
    """
    n = len(samples)
    # Free reshapes (contiguous), no concat on the host.
    samples_2d = [s.reshape(C, HW).astype(jnp.float32) for s in samples]

    # Fold (x - mean) / std  ->  x * scale + bias, pre-broadcast to (N*C, 1).
    scale = (1.0 / std).reshape(C, 1).astype(jnp.float32)
    bias = (-mean / std).reshape(C, 1).astype(jnp.float32)
    scale_nc = jnp.tile(scale, (n, 1))  # (n*C, 1)
    bias_nc = jnp.tile(bias, (n, 1))    # (n*C, 1)

    in_specs = [
        pl.BlockSpec(memory_space=pltpu.MemorySpace.VMEM)
        for _ in range(n + 2)
    ]
    out = pl.pallas_call(
        _make_collate_kernel(n),
        out_shape=jax.ShapeDtypeStruct((n * C, HW), jnp.float32),
        in_specs=in_specs,
        out_specs=pl.BlockSpec(memory_space=pltpu.MemorySpace.VMEM),
    )(*samples_2d, scale_nc, bias_nc)

    return out.reshape(n, C, H, W)


def _deterministic_payload_id(sample: str) -> int:
    # Stable across Python processes (unlike hash()).
    return sum((i + 1) * b for i, b in enumerate(sample.encode("utf-8"))) % 10007


class ServeInputProcessor:
    """JAX/Pallas counterpart of flash._ServeInputProcessor."""

    def __init__(self):
        # Deterministic "parameters" of the synthetic serve-input transform
        # (the torch module itself holds no weights).
        self.mean = jnp.arange(C, dtype=jnp.float32) * 0.1 + 0.25   # (C,)
        self.std = jnp.arange(C, dtype=jnp.float32) * 0.05 + 0.5    # (C,)

    def _call_load_sample(self, sample: str):
        # TODO(synk): real ServeInput decodes the string payload; here we map
        # the payload deterministically to synthetic tensors on the host.
        key = jax.random.fold_in(jax.random.PRNGKey(0),
                                 _deterministic_payload_id(sample))
        n_items = 2
        out = []
        for i in range(n_items):
            k = jax.random.fold_in(key, i)
            out.append(jax.random.uniform(k, (C, H, W), dtype=jnp.float32))
        return out

    def __call__(self, sample: str):
        loaded = self._call_load_sample(sample)
        if not isinstance(loaded, list):
            loaded = [loaded]
        return pallas_collate(loaded, self.mean, self.std)


if __name__ == "__main__":
    proc = ServeInputProcessor()
    batch = proc("serve_payload_0")
    batch = jax.block_until_ready(batch)

    # Reference check in plain JAX.
    samples = proc._call_load_sample("serve_payload_0")
    ref = jnp.stack(samples, axis=0)
    ref = (ref - proc.mean.reshape(1, C, 1, 1)) / proc.std.reshape(1, C, 1, 1)
    assert batch.shape == (2, C, H, W), batch.shape
    assert jnp.allclose(batch, ref, atol=1e-5, rtol=1e-5), float(
        jnp.max(jnp.abs(batch - ref)))
    print("KERNEL_OK")
</pallas_src>

<mosaic_0001>
module attributes {stable_mosaic.version = 11 : i64} {
  func.func @kernel(%arg0: memref<4x256xf32, #tpu.memory_space<vmem>>, %arg1: memref<4x256xf32, #tpu.memory_space<vmem>>, %arg2: memref<8x1xf32, #tpu.memory_space<vmem>>, %arg3: memref<8x1xf32, #tpu.memory_space<vmem>>, %arg4: memref<8x256xf32, #tpu.memory_space<vmem>>) attributes {dimension_semantics = [], scalar_prefetch = 0 : i64, scratch_operands = 0 : i64, tpu.core_type = #tpu.core_type<tc>} {
    %c0 = arith.constant 0 : index
    %c0_0 = arith.constant 0 : index
    %0 = vector.load %arg0[%c0, %c0_0] : memref<4x256xf32, #tpu.memory_space<vmem>>, vector<4x256xf32>
    %c0_1 = arith.constant 0 : index
    %c0_2 = arith.constant 0 : index
    %1 = vector.load %arg1[%c0_1, %c0_2] : memref<4x256xf32, #tpu.memory_space<vmem>>, vector<4x256xf32>
    %2 = tpu.concatenate %0, %1 in 0 : vector<4x256xf32>, vector<4x256xf32> -> vector<8x256xf32>
    %c0_3 = arith.constant 0 : index
    %c0_4 = arith.constant 0 : index
    %3 = vector.load %arg2[%c0_3, %c0_4] : memref<8x1xf32, #tpu.memory_space<vmem>>, vector<8x1xf32>
    %4 = vector.broadcast %3 : vector<8x1xf32> to vector<8x256xf32>
    %5 = arith.mulf %2, %4 : vector<8x256xf32>
    %c0_5 = arith.constant 0 : index
    %c0_6 = arith.constant 0 : index
    %6 = vector.load %arg3[%c0_5, %c0_6] : memref<8x1xf32, #tpu.memory_space<vmem>>, vector<8x1xf32>
    %7 = vector.broadcast %6 : vector<8x1xf32> to vector<8x256xf32>
    %8 = arith.addf %5, %7 : vector<8x256xf32>
    %c0_7 = arith.constant 0 : index
    %c0_8 = arith.constant 0 : index
    %9 = vector.load %arg4[%c0_7, %c0_8] : memref<8x256xf32, #tpu.memory_space<vmem>>, vector<8x256xf32>
    tpu.vector_store %arg4[%c0_7, %c0_8], %8 {strides = array<i32>} : memref<8x256xf32, #tpu.memory_space<vmem>>, vector<8x256xf32>,
    return
  }
}

</mosaic_0001>

<bundles_post_ra>
// kernel: tpu_custom_call.1
= control target key start
LH: loop header
LB: loop body
LE: loop exit
PB: predicated region body
PF: predicated region fallthrough
CT: control target
= control target key end

     0   :  { %s141_s0 = inlined_call_operand.vmem [shape: f32[4,256], index: 0, kind: input, shape index: {}]   ;;  %s142_s1 = inlined_call_operand.vmem [shape: f32[4,256], index: 1, kind: input, shape index: {}]   ;;  %s143_s2 = inlined_call_operand.vmem [shape: f32[8,1], index: 2, kind: input, shape index: {}]   ;;  %s144_s3 = inlined_call_operand.vmem [shape: f32[8,1], index: 3, kind: input, shape index: {}]   ;;  %s145_s4 = inlined_call_operand.hbm [shape: f32[8,256], index: 4, kind: output, shape index: {}]  }
   0x1   :  { %v36_v0 = vld [vmem:[%s143_s2] sm:$0xff] }
   0x2   :  { %9 = vsyncpa [#allocation3], 0  ;;  %v99_v1 = vmov 0   ;;  %v44_v2 = vld [vmem:[%s144_s3] sm:$0xff]  ;;  %vm33_vm0 = vcmask 1043456   ;;  %s100_s2 = smov [#allocation2]  }
   0x3   :  { %72 = vset.pattern.permute.xlu0 %v99_v1  ;;  %v18_v3 = vld [vmem:[%s141_s0] sm:$0xff]  ;;  %s59_s3 = sshll.u32 %s100_s2, 4  ;;  %s61_s24 = sshll.u32 %s145_s4, 4  ;;  %s60_s3 = int_to_ptr.vmem [resolvable:$true] %s59_s3  ;;  %s62_s24 = int_to_ptr.hbm [resolvable:$true] %s61_s24 }
   0x4   :  { %39 = vperm.xlu0 %72, %v36_v0   ;;  %21 = vst [vmem:[#allocation1] ss:$2 sm:$0xff] %v18_v3  ;;  %v19_v4 = vld [vmem:[%s142_s1] sm:$0xff] }
   0xb   :  { %v22_v5 = vld.sshfl [vmem:[#allocation1] sm:$0xff pattern:$0x75316420]  ;;  %v23_v6 = vld.sshfl [vmem:[#allocation1 + $0x8] sm:$0xff pattern:$0x75316420] }
   0xc   :  { %47 = vperm.xlu0 %72, %v44_v2   ;;  %28 = vst [vmem:[#allocation1 + $0x1] ss:$2 sm:$0xff] %v19_v4 }
  0x13   :  { %v29_v8 = vld.sshfl [vmem:[#allocation1] sm:$0xff pattern:$0x75316420]  ;;  %v30_v9 = vld.sshfl [vmem:[#allocation1 + $0x8] sm:$0xff pattern:$0x75316420] }
  0x14   :  { %v34_v10 = vsel %vm33_vm0, %v22_v5, %v29_v8  ;;  %v35_v11 = vsel %vm33_vm0, %v23_v6, %v30_v9 }
  0x76   :  { %v40_v7 = vpop.permute.xlu0 %39 }
  0x77   :  { %v42_v12 = vmul.f32 %v40_v7, %v34_v10  ;;  %v43_v13 = vmul.f32 %v40_v7, %v35_v11 }
  0x7e   :  { %v48_v14 = vpop.permute.xlu0 %47 }
  0x7f   :  { %v50_v15 = vadd.f32 %v48_v14, %v42_v12  ;;  %v51_v16 = vadd.f32 %v48_v14, %v43_v13 }
  0x81   :  { %52 = vst [vmem:[#allocation2] sm:$0xff] %v50_v15 }
  0x82   :  { %53 = vst [vmem:[#allocation2 + $0x8] sm:$0xff] %v51_v16 }
  0x83   :  { %64 = dma.vmem_to_hbm [thread:$0]  %s60_s3, 256, %s62_s24, [#allocation3]  }
  0x84   :  { %97 = dma.done.wait [#allocation3], 256  }
  0x85   :  { %98 = vsyncadd [#allocation3], 4294967040 }
  0x86   :  { %69 = vsyncpa [#allocation3], 1 }

</bundles_post_ra>
